<compile_context>
chip_gen: v6e
topology: v6e:2x2x1
jax: 0.10.0
libtpu: 0.0.40
codegen_flags: <defaults>
</compile_context>

<pallas_src>
import jax
import jax.numpy as jnp
from jax.experimental import pallas as pl
from jax.experimental.pallas import tpu as pltpu


def _fused_head_kernel(p_ref, w_ref, pool_ref, wc_ref, bc_ref, o_ref, acc_ref):
    # p_ref   : (tm, KKC+1)  bf16  im2col patches (+ ones column) for this M-tile
    # w_ref   : (KKC+1, C)   bf16  stem conv weight with bias folded in as last row
    # pool_ref: (B, tm)      f32   pooling matrix tile (1/HW where row belongs to batch b)
    # wc_ref  : (C, Tp)      f32   classifier weight, zero-padded to 128 lanes
    # bc_ref  : (1, Tp)      f32   classifier bias,   zero-padded to 128 lanes
    # o_ref   : (B, Tp)      f32   logits slab (lane-dense)
    # acc_ref : (B, C)       f32   resident pooled-feature accumulator
    step = pl.program_id(0)

    @pl.when(step == 0)
    def _():
        acc_ref[...] = jnp.zeros_like(acc_ref)

    # stem conv as one matmul (bias folded via augmented column), bf16 in / f32 accumulate
    feat = jnp.dot(p_ref[...], w_ref[...], preferred_element_type=jnp.float32)
    feat = jnp.maximum(feat, 0.0)  # ReLU

    # fused global-average-pool: (B, tm) @ (tm, C); pool matrix carries the 1/HW scale
    acc_ref[...] += jnp.dot(pool_ref[...], feat, preferred_element_type=jnp.float32)

    @pl.when(step == pl.num_programs(0) - 1)
    def _():
        logits = jnp.dot(acc_ref[...], wc_ref[...], preferred_element_type=jnp.float32)
        o_ref[...] = (logits + bc_ref[...]).astype(o_ref.dtype)


def custom_model_forward(x_nchw, params, *, ksize=3, stride=2, pad=1, tm=128):
    """x_nchw: (B, 1, H, W) float32. Returns logits (B, target_size)."""
    w_conv, b_conv, w_cls, b_cls = params          # (KKC,C), (1,C), (C,T), (1,T)
    B = x_nchw.shape[0]

    # --- glue: im2col patch extraction (NCHW in, flattened patch rows out) ---
    # TODO(synk): verify channel-flattening order matches PyTorch (out,in,kh,kw) weights
    # before loading a real checkpoint.
    patches = jax.lax.conv_general_dilated_patches(
        x_nchw.astype(jnp.float32),
        filter_shape=(ksize, ksize),
        window_strides=(stride, stride),
        padding=((pad, pad), (pad, pad)),
    )                                              # (B, Cin*K*K, Ho, Wo)
    _, KKC, Ho, Wo = patches.shape
    HW = Ho * Wo
    M = B * HW
    patches = patches.transpose(0, 2, 3, 1).reshape(M, KKC)

    C = w_conv.shape[1]
    T = w_cls.shape[1]

    # fold the conv bias into the matmul: augment patches with a ones column, weight with bias row
    patches_aug = jnp.concatenate([patches, jnp.ones((M, 1), jnp.float32)], axis=1)  # (M, KKC+1)
    w_aug = jnp.concatenate([w_conv, b_conv], axis=0)                                # (KKC+1, C)

    # bf16 feed, f32 accumulation in the kernel
    patches_aug = patches_aug.astype(jnp.bfloat16)
    w_aug = w_aug.astype(jnp.bfloat16)

    # pad M up to a multiple of the row-tile (pad rows are all-zero and get zero pool weight)
    Mp = ((M + tm - 1) // tm) * tm
    if Mp != M:
        patches_aug = jnp.pad(patches_aug, ((0, Mp - M), (0, 0)))
    KKCa = KKC + 1

    # pooling matrix: (B, Mp), entry = 1/HW where the patch row belongs to batch b, else 0
    row_batch = jnp.arange(Mp) // HW
    pool_mat = (row_batch[None, :] == jnp.arange(B)[:, None]).astype(jnp.float32) / HW

    # lane-dense classifier: zero-pad target dim to a multiple of 128 lanes
    Tp = ((T + 127) // 128) * 128
    w_cls_p = jnp.pad(w_cls.astype(jnp.float32), ((0, 0), (0, Tp - T)))
    b_cls_p = jnp.pad(b_cls.astype(jnp.float32), ((0, 0), (0, Tp - T)))

    grid = (Mp // tm,)
    out = pl.pallas_call(
        _fused_head_kernel,
        out_shape=jax.ShapeDtypeStruct((B, Tp), jnp.float32),
        grid_spec=pltpu.PrefetchScalarGridSpec(
            num_scalar_prefetch=0,
            grid=grid,
            in_specs=[
                pl.BlockSpec((tm, KKCa), lambda i: (i, 0)),   # patch rows: tiled over M
                pl.BlockSpec((KKCa, C), lambda i: (0, 0)),    # stem weight (+bias row): resident
                pl.BlockSpec((B, tm), lambda i: (0, i)),      # pool matrix: tiled over M
                pl.BlockSpec((C, Tp), lambda i: (0, 0)),      # classifier weight: resident
                pl.BlockSpec((1, Tp), lambda i: (0, 0)),      # classifier bias: resident
            ],
            out_specs=pl.BlockSpec((B, Tp), lambda i: (0, 0)),
            scratch_shapes=[pltpu.VMEM((B, C), jnp.float32)],
        ),
        compiler_params=pltpu.CompilerParams(
            dimension_semantics=("arbitrary",),        # M axis is a reduction (resident acc)
            vmem_limit_bytes=32 * 1024 * 1024,
        ),
    )(patches_aug, w_aug, pool_mat, w_cls_p, b_cls_p)

    return out[:, :T]


def _reference(x_nchw, params, *, ksize=3, stride=2, pad=1, mirror_bf16=False):
    """Pure-JAX reference. mirror_bf16=True mimics the kernel's bf16-fed stem matmul."""
    w_conv, b_conv, w_cls, b_cls = params
    B = x_nchw.shape[0]
    patches = jax.lax.conv_general_dilated_patches(
        x_nchw.astype(jnp.float32), (ksize, ksize), (stride, stride),
        ((pad, pad), (pad, pad)))
    _, KKC, Ho, Wo = patches.shape
    patches = patches.transpose(0, 2, 3, 1).reshape(B, Ho * Wo, KKC)
    wc, bc = w_conv, b_conv
    if mirror_bf16:
        patches = patches.astype(jnp.bfloat16).astype(jnp.float32)
        wc = wc.astype(jnp.bfloat16).astype(jnp.float32)
        bc = bc.astype(jnp.bfloat16).astype(jnp.float32)
    feat = jnp.maximum(patches @ wc + bc, 0.0)
    pooled = feat.mean(axis=1)
    return pooled @ w_cls + b_cls


if __name__ == "__main__":
    # small shapes consistent with the module: batch=2, in_chans=1, 16x16 input,
    # stem features n_features=32 (the "classifier.in_features"), target_size=5
    B, Cin, H, W = 2, 1, 16, 16
    KSIZE, CFEAT, TARGET = 3, 32, 5

    key = jax.random.PRNGKey(0)
    kx, kw, kb, kwc, kbc = jax.random.split(key, 5)

    x = jax.random.normal(kx, (B, Cin, H, W), dtype=jnp.float32)

    # deterministic parameter init (synthetic; not loaded from a checkpoint)
    w_conv = jax.random.normal(kw, (Cin * KSIZE * KSIZE, CFEAT), dtype=jnp.float32) * 0.1
    b_conv = jax.random.normal(kb, (1, CFEAT), dtype=jnp.float32) * 0.01
    w_cls = jax.random.normal(kwc, (CFEAT, TARGET), dtype=jnp.float32) * 0.1
    b_cls = jax.random.normal(kbc, (1, TARGET), dtype=jnp.float32) * 0.01
    params = (w_conv, b_conv, w_cls, b_cls)

    out = custom_model_forward(x, params)
    out = jax.block_until_ready(out)
    assert out.shape == (B, TARGET)

    # tight check against a reference with the same bf16-fed / f32-accumulated stem matmul
    ref_bf16 = _reference(x, params, mirror_bf16=True)
    assert jnp.allclose(out, ref_bf16, atol=1e-3, rtol=1e-3), "mismatch vs bf16-mirrored reference"

    # looser check against the full-f32 module semantics (bf16 feed only perturbs inputs ~2^-9)
    ref_f32 = _reference(x, params, mirror_bf16=False)
    assert jnp.allclose(out, ref_f32, atol=2e-2, rtol=2e-2), "mismatch vs f32 reference"

    print("KERNEL_OK")
</pallas_src>

<mosaic_0001>
module attributes {stable_mosaic.version = 11 : i64} {
  func.func @_fused_head_kernel(%arg0: i32, %arg1: memref<128x10xbf16, #tpu.memory_space<vmem>>, %arg2: memref<10x32xbf16, #tpu.memory_space<vmem>>, %arg3: memref<2x128xf32, #tpu.memory_space<vmem>>, %arg4: memref<32x128xf32, #tpu.memory_space<vmem>>, %arg5: memref<1x128xf32, #tpu.memory_space<vmem>>, %arg6: memref<2x128xf32, #tpu.memory_space<vmem>>, %arg7: memref<2x32xf32, #tpu.memory_space<vmem>>) attributes {dimension_semantics = [#tpu.dimension_semantics<arbitrary>], iteration_bounds = array<i64: 1>, scalar_prefetch = 0 : i64, scratch_operands = 1 : i64, tpu.core_type = #tpu.core_type<tc>, window_params = [{transform_indices = @transform_0, window_bounds = array<i64: 128, 10>}, {pipeline_mode = #tpu.pipeline_mode<synchronous>, transform_indices = @transform_1, window_bounds = array<i64: 10, 32>}, {transform_indices = @transform_2, window_bounds = array<i64: 2, 128>}, {pipeline_mode = #tpu.pipeline_mode<synchronous>, transform_indices = @transform_3, window_bounds = array<i64: 32, 128>}, {pipeline_mode = #tpu.pipeline_mode<synchronous>, transform_indices = @transform_4, window_bounds = array<i64: 1, 128>}, {pipeline_mode = #tpu.pipeline_mode<synchronous>, transform_indices = @transform_5, window_bounds = array<i64: 2, 128>}]} {
    %c0_i32 = arith.constant 0 : i32
    %0 = arith.cmpi eq, %arg0, %c0_i32 : i32
    %1 = arith.extui %0 : i1 to i32
    %c0_i32_0 = arith.constant 0 : i32
    %2 = arith.cmpi ne, %1, %c0_i32_0 : i32
    scf.if %2 {
      %cst_14 = arith.constant 0.000000e+00 : f32
      %16 = vector.broadcast %cst_14 : f32 to vector<2x32xf32>
      %c0_15 = arith.constant 0 : index
      %c0_16 = arith.constant 0 : index
      %17 = vector.load %arg7[%c0_15, %c0_16] : memref<2x32xf32, #tpu.memory_space<vmem>>, vector<2x32xf32>
      tpu.vector_store %arg7[%c0_15, %c0_16], %16 {strides = array<i32>} : memref<2x32xf32, #tpu.memory_space<vmem>>, vector<2x32xf32>,
    } else {
    }
    %c0 = arith.constant 0 : index
    %c0_1 = arith.constant 0 : index
    %3 = vector.load %arg1[%c0, %c0_1] : memref<128x10xbf16, #tpu.memory_space<vmem>>, vector<128x10xbf16>
    %c0_2 = arith.constant 0 : index
    %c0_3 = arith.constant 0 : index
    %4 = vector.load %arg2[%c0_2, %c0_3] : memref<10x32xbf16, #tpu.memory_space<vmem>>, vector<10x32xbf16>
    %cst = arith.constant dense<0.000000e+00> : vector<128x32xf32>
    %5 = tpu.matmul %3, %4, %cst {dimension_numbers = #tpu.dot_dimension_numbers<[1], [0], [0], [1], [0, 0, 1, 1], [], []>} : vector<128x10xbf16>, vector<10x32xbf16>, vector<128x32xf32> -> vector<128x32xf32>
    %cst_4 = arith.constant 0.000000e+00 : f32
    %6 = vector.broadcast %cst_4 : f32 to vector<128x32xf32>
    %7 = arith.maximumf %5, %6 : vector<128x32xf32>
    %c0_5 = arith.constant 0 : index
    %c0_6 = arith.constant 0 : index
    %8 = vector.load %arg7[%c0_5, %c0_6] : memref<2x32xf32, #tpu.memory_space<vmem>>, vector<2x32xf32>
    %c0_7 = arith.constant 0 : index
    %c0_8 = arith.constant 0 : index
    %9 = vector.load %arg3[%c0_7, %c0_8] : memref<2x128xf32, #tpu.memory_space<vmem>>, vector<2x128xf32>
    %cst_9 = arith.constant dense<0.000000e+00> : vector<2x32xf32>
    %10 = tpu.matmul %9, %7, %cst_9 {dimension_numbers = #tpu.dot_dimension_numbers<[1], [0], [0], [1], [0, 0, 1, 1], [], []>} : vector<2x128xf32>, vector<128x32xf32>, vector<2x32xf32> -> vector<2x32xf32>
    %11 = arith.addf %8, %10 : vector<2x32xf32>
    %c0_10 = arith.constant 0 : index
    %c0_11 = arith.constant 0 : index
    %12 = vector.load %arg7[%c0_10, %c0_11] : memref<2x32xf32, #tpu.memory_space<vmem>>, vector<2x32xf32>
    tpu.vector_store %arg7[%c0_10, %c0_11], %11 {strides = array<i32>} : memref<2x32xf32, #tpu.memory_space<vmem>>, vector<2x32xf32>,
    %c0_i32_12 = arith.constant 0 : i32
    %13 = arith.cmpi eq, %arg0, %c0_i32_12 : i32
    %14 = arith.extui %13 : i1 to i32
    %c0_i32_13 = arith.constant 0 : i32
    %15 = arith.cmpi ne, %14, %c0_i32_13 : i32
    scf.if %15 {
      %c0_14 = arith.constant 0 : index
      %c0_15 = arith.constant 0 : index
      %16 = vector.load %arg7[%c0_14, %c0_15] : memref<2x32xf32, #tpu.memory_space<vmem>>, vector<2x32xf32>
      %c0_16 = arith.constant 0 : index
      %c0_17 = arith.constant 0 : index
      %17 = vector.load %arg4[%c0_16, %c0_17] : memref<32x128xf32, #tpu.memory_space<vmem>>, vector<32x128xf32>
      %cst_18 = arith.constant dense<0.000000e+00> : vector<2x128xf32>
      %18 = tpu.matmul %16, %17, %cst_18 {dimension_numbers = #tpu.dot_dimension_numbers<[1], [0], [0], [1], [0, 0, 1, 1], [], []>} : vector<2x32xf32>, vector<32x128xf32>, vector<2x128xf32> -> vector<2x128xf32>
      %c0_19 = arith.constant 0 : index
      %c0_20 = arith.constant 0 : index
      %19 = vector.load %arg5[%c0_19, %c0_20] : memref<1x128xf32, #tpu.memory_space<vmem>>, vector<1x128xf32>
      %20 = vector.broadcast %19 : vector<1x128xf32> to vector<2x128xf32>
      %21 = arith.addf %18, %20 : vector<2x128xf32>
      %c0_21 = arith.constant 0 : index
      %c0_22 = arith.constant 0 : index
      %22 = vector.load %arg6[%c0_21, %c0_22] : memref<2x128xf32, #tpu.memory_space<vmem>>, vector<2x128xf32>
      tpu.vector_store %arg6[%c0_21, %c0_22], %21 {strides = array<i32>} : memref<2x128xf32, #tpu.memory_space<vmem>>, vector<2x128xf32>,
    } else {
    }
    return
  }
  func.func @transform_0(%arg0: i32) -> (i32, i32) {
    %c0_i32 = arith.constant 0 : i32
    %c0_i32_0 = arith.constant 0 : i32
    return %arg0, %c0_i32 : i32, i32
  }
  func.func @transform_1(%arg0: i32) -> (i32, i32) {
    %c0_i32 = arith.constant 0 : i32
    %c0_i32_0 = arith.constant 0 : i32
    %c0_i32_1 = arith.constant 0 : i32
    return %c0_i32, %c0_i32_0 : i32, i32
  }
  func.func @transform_2(%arg0: i32) -> (i32, i32) {
    %c0_i32 = arith.constant 0 : i32
    %c0_i32_0 = arith.constant 0 : i32
    return %c0_i32, %arg0 : i32, i32
  }
  func.func @transform_3(%arg0: i32) -> (i32, i32) {
    %c0_i32 = arith.constant 0 : i32
    %c0_i32_0 = arith.constant 0 : i32
    %c0_i32_1 = arith.constant 0 : i32
    return %c0_i32, %c0_i32_0 : i32, i32
  }
  func.func @transform_4(%arg0: i32) -> (i32, i32) {
    %c0_i32 = arith.constant 0 : i32
    %c0_i32_0 = arith.constant 0 : i32
    %c0_i32_1 = arith.constant 0 : i32
    return %c0_i32, %c0_i32_0 : i32, i32
  }
  func.func @transform_5(%arg0: i32) -> (i32, i32) {
    %c0_i32 = arith.constant 0 : i32
    %c0_i32_0 = arith.constant 0 : i32
    %c0_i32_1 = arith.constant 0 : i32
    return %c0_i32, %c0_i32_0 : i32, i32
  }
}

</mosaic_0001>

<bundles_post_ra>
// kernel: tpu_custom_call.1
= control target key start
LH: loop header
LB: loop body
LE: loop exit
PB: predicated region body
PF: predicated region fallthrough
CT: control target
= control target key end

     0   :  { %vm116_vm0 = vcmask 1044480   ;;  %vm91_vm1 = vcmask 80896   ;;  %s675_s0 = inlined_call_operand.vmem [shape: bf16[128,10], index: 0, kind: input, shape index: {}]   ;;  %s676_s1 = inlined_call_operand.vmem [shape: bf16[10,32], index: 1, kind: input, shape index: {}]   ;;  %s677_s2 = inlined_call_operand.vmem [shape: f32[2,128], index: 2, kind: input, shape index: {}]   ;;  %s678_s3 = inlined_call_operand.vmem [shape: f32[32,128], index: 3, kind: input, shape index: {}]   ;;  %s679_s4 = inlined_call_operand.vmem [shape: f32[1,128], index: 4, kind: input, shape index: {}]   ;;  %s680_s5 = inlined_call_operand.hbm [shape: f32[2,128], index: 5, kind: output, shape index: {}]  }
   0x1   :  { %v530_v0 = vld [vmem:[%s676_s1] sm:$0x1f]   ;;  %v532_v3 = vld [vmem:[%s675_s0 + $0x8] sm:$0xff]   ;;  %v533_v4 = vld [vmem:[%s675_s0 + $0x10] sm:$0xff]  }
   0x2   :  { %v531_v1 = vld [vmem:[%s675_s0] sm:$0xff]   ;;  %526 = vmatprep.subr.msk.bf16.mxu0 %vm116_vm0, %v530_v0  ;;  %v118_v2 = vsel %vm116_vm0, %v530_v0, 0 }
   0x3   :  { %463 = vmatpush3.bf16.msra.mxu0 %v118_v2  ;;  %464 = vmatprep.mubr.msk.bf16.mxu0 %vm91_vm1, %v531_v1 }
   0x6   :  { %465 = vmatmul.mubr.msk.bf16.vlgmr.msra.gmra.mxu0 %vm91_vm1, %v532_v3 }
   0x7   :  { %468 = vmatprep.mubr.msk.bf16.mxu0 %vm91_vm1, %v533_v4 }
   0x8   :  { %10 = vsyncpa [#allocation4], 0  ;;  %v534_v5 = vld [vmem:[%s675_s0 + $0x18] sm:$0xff]   ;;  %v535_v6 = vld [vmem:[%s675_s0 + $0x20] sm:$0xff]   ;;  %v561_v10 = vmov 0.0   ;;  %vm562_vm2 = vmmov 0  }
   0x9   :  { %v536_v7 = vld [vmem:[%s675_s0 + $0x28] sm:$0xff]   ;;  %v537_v8 = vld [vmem:[%s675_s0 + $0x30] sm:$0xff]   ;;  %v538_v9 = vld [vmem:[%s675_s0 + $0x38] sm:$0xff]   ;;  %480 = vmatprep.subr.mxu1 %v561_v10  ;;  %515 = vmatprep.subr.mxu0 %v561_v10  ;;  %vm26_vm3 = vcmask 254976   ;;  %vm323_vm4 = vcmask 261120   ;;  %s563_s20 = smov [#allocation3]  }
   0xa   :  { %512 = vmatprep.mubr.msk.f32.mxu1 %vm562_vm2, %v561_v10  ;;  %v315_v11 = vld [vmem:[%s678_s3 + $0x18] sm:$0xff]  ;;  %v314_v12 = vld [vmem:[%s678_s3 + $0x10] sm:$0xff]  ;;  %27 = vst.msk [vmem:[#allocation2] sm:$0x3] %vm26_vm3, %v561_v10  ;;  %v313_v13 = vld [vmem:[%s678_s3 + $0x8] sm:$0xff]  ;;  %s404_s21 = sshll.u32 %s563_s20, 4  ;;  %s405_s21 = int_to_ptr.vmem [resolvable:$true] %s404_s21 }
   0xb   :  { %516 = vmatpush3.msra.mxu0 %v315_v11  ;;  %v234_v46 = vld [vmem:[%s677_s2] sm:$0x3]  ;;  %p544_p1 = scmp.lt.s32.totalorder %s405_s21, %s405_s21 }
   0xc   :  { %517 = vmatprep.subr.mxu0 %v561_v10  ;;  %v312_v47 = vld [vmem:[%s678_s3] sm:$0xff]  ;;  %s539_s3 = scalar_lea.vmem %s405_s21, 32 }
   0xd   :  { %518 = vmatpush3.msra.mxu0 %v314_v12  ;;  %v429_v53 = vld [vmem:[%s679_s4] ss:$0 sm:$0xff]  ;;  %p540_p0 = scmp.ne.s32.totalorder %s405_s21, %s539_s3  ;;  %p545_p2 = scmp.lt.s32.totalorder %s539_s3, %s539_s3 }
   0xe   :  { %469 = vmatmul.mubr.msk.bf16.gmra.mxu0 %vm91_vm1, %v534_v5  ;;  %519 = vmatprep.subr.mxu0 %v561_v10 }
   0xf   :  { %472 = vmatprep.mubr.msk.bf16.mxu0 %vm91_vm1, %v535_v6  ;;  %520 = vmatpush3.msra.mxu0 %v313_v13  ;;  %p546_p3 = por %p545_p2, %p544_p1 }
  0x10   :  { %521 = vmatprep.subr.mxu0 %v561_v10 }
  0x11   :  { %522 = vmatpush3.msra.mxu0 %v312_v47  ;;  %v233_v48 = vld [vmem:[#allocation2] sm:$0x3]  ;;  %p547_p4 = pnand %p546_p3, %p540_p0 }
  0x16   :  { %473 = vmatmul.mubr.msk.bf16.gmra.mxu0 %vm91_vm1, %v536_v7 }
  0x17   :  { %476 = vmatprep.mubr.msk.bf16.mxu0 %vm91_vm1, %v537_v8 }
  0x1e   :  { %477 = vmatmul.mubr.msk.bf16.gmra.mxu0 %vm91_vm1, %v538_v9 }
  0x1f   :  { %523 = vmatprep.mubr.msk.f32.mxu0 %vm562_vm2, %v561_v10 }
  0xc6   :  { %v466_v14 = vpop.f32.mrf.mxu0 }
  0xc7   :  { %v219_v43 = vmax.f32 %v466_v14, 0.0 }
  0xc8   :  { %v154_v15 = vpop.f32.mrf.mxu0 }
  0xc9   :  { %v217_v45 = vmax.f32 %v154_v15, 0.0 }
  0xca   :  { %v467_v16 = vpop.f32.mrf.mxu0 }
  0xcb   :  { %v220_v42 = vmax.f32 %v467_v16, 0.0 }
  0xcc   :  { %v157_v17 = vpop.f32.mrf.mxu0 }
  0xcd   :  { %v218_v44 = vmax.f32 %v157_v17, 0.0 }
  0xce   :  { %v470_v18 = vpop.f32.mrf.mxu0 }
  0xcf   :  { %v223_v39 = vmax.f32 %v470_v18, 0.0 }
  0xd0   :  { %v170_v19 = vpop.f32.mrf.mxu0 }
  0xd1   :  { %v221_v41 = vmax.f32 %v170_v19, 0.0 }
  0xd2   :  { %v471_v20 = vpop.f32.mrf.mxu0 }
  0xd3   :  { %v224_v38 = vmax.f32 %v471_v20, 0.0 }
  0xd4   :  { %v173_v21 = vpop.f32.mrf.mxu0 }
  0xd5   :  { %v222_v40 = vmax.f32 %v173_v21, 0.0 }
  0xd6   :  { %v474_v22 = vpop.f32.mrf.mxu0 }
  0xd7   :  { %v227_v35 = vmax.f32 %v474_v22, 0.0 }
  0xd8   :  { %v186_v23 = vpop.f32.mrf.mxu0 }
  0xd9   :  { %v225_v37 = vmax.f32 %v186_v23, 0.0 }
  0xda   :  { %v475_v24 = vpop.f32.mrf.mxu0 }
  0xdb   :  { %v228_v34 = vmax.f32 %v475_v24, 0.0 }
  0xdc   :  { %v189_v25 = vpop.f32.mrf.mxu0 }
  0xdd   :  { %v226_v36 = vmax.f32 %v189_v25, 0.0 }
  0xde   :  { %v478_v26 = vpop.f32.mrf.mxu0 }
  0xdf   :  { %v231_v31 = vmax.f32 %v478_v26, 0.0 }
  0xe0   :  { %v202_v27 = vpop.f32.mrf.mxu0 }
  0xe1   :  { %v229_v33 = vmax.f32 %v202_v27, 0.0 }
  0xe2   :  { %v479_v28 = vpop.f32.mrf.mxu0 }
  0xe3   :  { %v232_v29 = vmax.f32 %v479_v28, 0.0 }
  0xe4   :  { %v205_v30 = vpop.f32.mrf.mxu0 }
  0xe5   :  { %481 = vmatpush3.msra.mxu1 %v232_v29  ;;  %v230_v32 = vmax.f32 %v205_v30, 0.0 }
  0xe6   :  { %482 = vmatprep.subr.mxu1 %v561_v10 }
  0xe7   :  { %483 = vmatpush3.msra.mxu1 %v231_v31 }
  0xe8   :  { %484 = vmatprep.subr.mxu1 %v561_v10 }
  0xe9   :  { %485 = vmatpush3.msra.mxu1 %v230_v32 }
  0xea   :  { %486 = vmatprep.subr.mxu1 %v561_v10 }
  0xeb   :  { %487 = vmatpush3.msra.mxu1 %v229_v33 }
  0xec   :  { %488 = vmatprep.subr.mxu1 %v561_v10 }
  0xed   :  { %489 = vmatpush3.msra.mxu1 %v228_v34 }
  0xee   :  { %490 = vmatprep.subr.mxu1 %v561_v10 }
  0xef   :  { %491 = vmatpush3.msra.mxu1 %v227_v35 }
  0xf0   :  { %492 = vmatprep.subr.mxu1 %v561_v10 }
  0xf1   :  { %493 = vmatpush3.msra.mxu1 %v226_v36 }
  0xf2   :  { %494 = vmatprep.subr.mxu1 %v561_v10 }
  0xf3   :  { %495 = vmatpush3.msra.mxu1 %v225_v37 }
  0xf4   :  { %496 = vmatprep.subr.mxu1 %v561_v10 }
  0xf5   :  { %497 = vmatpush3.msra.mxu1 %v224_v38 }
  0xf6   :  { %498 = vmatprep.subr.mxu1 %v561_v10 }
  0xf7   :  { %499 = vmatpush3.msra.mxu1 %v223_v39 }
  0xf8   :  { %500 = vmatprep.subr.mxu1 %v561_v10 }
  0xf9   :  { %501 = vmatpush3.msra.mxu1 %v222_v40 }
  0xfa   :  { %502 = vmatprep.subr.mxu1 %v561_v10 }
  0xfb   :  { %503 = vmatpush3.msra.mxu1 %v221_v41 }
  0xfc   :  { %504 = vmatprep.subr.mxu1 %v561_v10 }
  0xfd   :  { %505 = vmatpush3.msra.mxu1 %v220_v42 }
  0xfe   :  { %506 = vmatprep.subr.mxu1 %v561_v10 }
  0xff   :  { %507 = vmatpush3.msra.mxu1 %v219_v43 }
 0x100   :  { %508 = vmatprep.subr.mxu1 %v561_v10 }
 0x101   :  { %509 = vmatpush3.msra.mxu1 %v218_v44 }
 0x102   :  { %510 = vmatprep.subr.mxu1 %v561_v10 }
 0x103   :  { %511 = vmatpush3.msra.mxu1 %v217_v45 }
 0x104   :  { %513 = vmatmul.mubr.f32.vlgmr.msra.gmra.mxu1 %v234_v46 }
 0x1c4   :  { %v301_v49 = vpop.f32.mrf.mxu1 }
 0x1c5   :  { %v305_v50 = vadd.f32 %v301_v49, %v233_v48 }
 0x1c6   :  { %v514_v51 = vpop.f32.mrf.mxu1 }
 0x1c7   :  { %307 = vst.msk [vmem:[#allocation2] sm:$0x3] %vm26_vm3, %v305_v50 }
 0x1ce   :  { %v311_v52 = vld [vmem:[#allocation2] sm:$0x3] }
 0x1cf   :  { %524 = vmatmul.mubr.msk.f32.vlgmr.msra.gmra.mxu0 %vm323_vm4, %v311_v52 }
 0x28f   :  { %v393_v54 = vpop.f32.mrf.mxu0 }
 0x290   :  { %v394_v55 = vadd.f32 %v429_v53, %v393_v54 }
 0x291   :  { %v525_v56 = vpop.f32.mrf.mxu0 }
 0x292   :  { %397 = vst [vmem:[#allocation3] sm:$0x3] %v394_v55 }
 0x293   :  { %550 = shalt.err (!%p547_p4)
}
 0x294   :  { %407 = dma.vmem_to_hbm [thread:$0]  %s405_s21, 32, %s680_s5, [#allocation4]  }
 0x295   :  { %559 = dma.done.wait [#allocation4], 32  }
 0x296   :  { %560 = vsyncadd [#allocation4], 4294967264 }
 0x297   :  { %411 = vsyncpa [#allocation4], 1 }

</bundles_post_ra>
